<compile_context>
chip_gen: v7x
topology: tpu7x:2x2x1
jax: 0.10.0
libtpu: 0.0.40
codegen_flags: <defaults>
</compile_context>

<pallas_src>
import jax
import jax.numpy as jnp
import numpy as np
from jax.experimental import pallas as pl
from jax.experimental.pallas import tpu as pltpu


def _model_kernel(x_ref, inp_ref, w_ref, v1_ref, o2_ref, o3_ref):
    x = x_ref[...].astype(jnp.float32)       # (N, F)
    inp = inp_ref[...].astype(jnp.float32)   # (N, F)
    n, f = x.shape

    # --- BatchNorm1d: training-mode batch stats, biased var, affine=False ---
    mean = jnp.mean(x, axis=0, keepdims=True)            # (1, F)
    xc = x - mean
    var = jnp.mean(xc * xc, axis=0, keepdims=True)       # (1, F), two-pass (stable)
    x1 = xc * jax.lax.rsqrt(var + 1e-5)                  # (N, F), rsqrt on EUP

    lane = jax.lax.broadcasted_iota(jnp.int32, (n, f), 1)   # lane (column) index
    sub = jax.lax.broadcasted_iota(jnp.int32, (n, f), 0)    # sublane (row) index

    # --- v1 = x1 @ W.T : unrolled scalar-broadcast FMAs, weights from SMEM ---
    # Columns accumulated as independent masked contributions (ILP, no select chain).
    v1 = jnp.zeros((n, f), jnp.float32)
    for j in range(f):
        col = x1[:, 0:1] * w_ref[j * f]                  # (N, 1) * smem scalar
        for k in range(1, f):
            col = col + x1[:, k:k + 1] * w_ref[j * f + k]
        v1 = v1 + jnp.where(lane == j, col, 0.0)

    v2 = v1 + x1

    # --- v3 = v2 @ v2 = sum_k outer(v2[:, k], v2[k, :]) ---
    # Row k is obtained by mask + cross-sublane reduce (exact f32; no (1,1) vreg
    # slice extraction, no MXU round trip).
    v3 = jnp.zeros((n, f), jnp.float32)
    for k in range(f):
        row_k = jnp.sum(jnp.where(sub == k, v2, 0.0), axis=0, keepdims=True)  # (1, F)
        v3 = v3 + v2[:, k:k + 1] * row_k

    v1_ref[...] = v1.astype(v1_ref.dtype)
    o2_ref[...] = (v3 + inp).astype(o2_ref.dtype)
    o3_ref[...] = (v1 + x).astype(o3_ref.dtype)          # detach() == identity in fwd


@jax.jit
def model_forward_batched(x, inp, w):
    """x, inp: (B, N, F); w: (F, F) in PyTorch layout (out_features, in_features)."""
    b, n, f = x.shape
    w_flat = w.reshape(f * f)                            # 1-D SMEM: 64 B, simple sld
    io_spec = pl.BlockSpec((None, n, f), lambda i: (i, 0, 0))
    out_sds = jax.ShapeDtypeStruct((b, n, f), jnp.float32)
    return pl.pallas_call(
        _model_kernel,
        out_shape=(out_sds, out_sds, out_sds),
        grid_spec=pltpu.PrefetchScalarGridSpec(
            num_scalar_prefetch=0,
            grid=(b,),
            in_specs=[
                io_spec,                                               # x
                io_spec,                                               # inp
                pl.BlockSpec(memory_space=pltpu.MemorySpace.SMEM),     # w (9 scalars)
            ],
            out_specs=[io_spec, io_spec, io_spec],
        ),
        compiler_params=pltpu.CompilerParams(
            dimension_semantics=("parallel",)),           # megacore / v7x dual-TC
        cost_estimate=pl.CostEstimate(
            flops=250 * b, transcendentals=3 * b,
            bytes_accessed=4 * (5 * n * f * b + f * f)),
    )(x, inp, w_flat)


@jax.jit
def model_forward(x, inp, w):
    """Module-faithful single-instance forward: x, inp are (3, 3)."""
    v1, o2, o3 = model_forward_batched(x[None], inp[None], w)
    return v1[0], o2[0], o3[0]


def _ref_forward_np(x, inp, w):
    """Host float64 reference (independent of TPU matmul precision)."""
    x = np.asarray(x, np.float64)
    inp = np.asarray(inp, np.float64)
    w = np.asarray(w, np.float64)
    mean = x.mean(axis=0, keepdims=True)
    xc = x - mean
    var = (xc * xc).mean(axis=0, keepdims=True)
    x1 = xc / np.sqrt(var + 1e-5)
    v1 = x1 @ w.T
    v2 = v1 + x1
    v3 = v2 @ v2
    return v1, v3 + inp, v1 + x


if __name__ == "__main__":
    key = jax.random.PRNGKey(0)
    kx, kinp, kw, kbx, kbi = jax.random.split(key, 5)

    # Shapes consistent with the module: (3, 3) everywhere.
    x = jax.random.normal(kx, (3, 3), dtype=jnp.float32)
    inp = jax.random.normal(kinp, (3, 3), dtype=jnp.float32)
    bound = 1.0 / float(np.sqrt(3.0))
    w = jax.random.uniform(kw, (3, 3), dtype=jnp.float32, minval=-bound, maxval=bound)

    # --- single instance (exactly the PyTorch forward) ---
    v1, o2, o3 = model_forward(x, inp, w)
    jax.block_until_ready((v1, o2, o3))
    r1, r2, r3 = _ref_forward_np(x, inp, w)
    np.testing.assert_allclose(np.asarray(v1), r1, rtol=1e-3, atol=1e-3)
    np.testing.assert_allclose(np.asarray(o2), r2, rtol=1e-3, atol=1e-3)
    np.testing.assert_allclose(np.asarray(o3), r3, rtol=1e-3, atol=1e-3)

    # --- batched: many independent (3,3) problems behind one pallas_call ---
    B = 8
    xb = jax.random.normal(kbx, (B, 3, 3), dtype=jnp.float32)
    ib = jax.random.normal(kbi, (B, 3, 3), dtype=jnp.float32)
    bv1, bo2, bo3 = model_forward_batched(xb, ib, w)
    jax.block_until_ready((bv1, bo2, bo3))
    for bidx in range(B):
        rb1, rb2, rb3 = _ref_forward_np(xb[bidx], ib[bidx], w)
        np.testing.assert_allclose(np.asarray(bv1[bidx]), rb1, rtol=1e-3, atol=1e-3)
        np.testing.assert_allclose(np.asarray(bo2[bidx]), rb2, rtol=1e-3, atol=1e-3)
        np.testing.assert_allclose(np.asarray(bo3[bidx]), rb3, rtol=1e-3, atol=1e-3)

    print("KERNEL_OK")
</pallas_src>

<mosaic_0001>
module attributes {stable_mosaic.version = 11 : i64} {
  func.func @_model_kernel(%arg0: i32, %arg1: memref<1x3x3xf32, #tpu.memory_space<vmem>>, %arg2: memref<1x3x3xf32, #tpu.memory_space<vmem>>, %arg3: memref<9xf32, #tpu.memory_space<smem>>, %arg4: memref<1x3x3xf32, #tpu.memory_space<vmem>>, %arg5: memref<1x3x3xf32, #tpu.memory_space<vmem>>, %arg6: memref<1x3x3xf32, #tpu.memory_space<vmem>>) attributes {dimension_semantics = [#tpu.dimension_semantics<parallel>], iteration_bounds = array<i64: 1>, scalar_prefetch = 0 : i64, scratch_operands = 0 : i64, tpu.core_type = #tpu.core_type<tc>, window_params = [{transform_indices = @transform_0, window_bounds = array<i64: 1, 3, 3>}, {transform_indices = @transform_1, window_bounds = array<i64: 1, 3, 3>}, {transform_indices = @transform_2, window_bounds = array<i64: 9>}, {transform_indices = @transform_3, window_bounds = array<i64: 1, 3, 3>}, {transform_indices = @transform_4, window_bounds = array<i64: 1, 3, 3>}, {transform_indices = @transform_5, window_bounds = array<i64: 1, 3, 3>}]} {
    %c0 = arith.constant 0 : index
    %c0_0 = arith.constant 0 : index
    %c0_1 = arith.constant 0 : index
    %0 = vector.load %arg1[%c0, %c0_0, %c0_1] : memref<1x3x3xf32, #tpu.memory_space<vmem>>, vector<1x3x3xf32>
    %1 = vector.shape_cast %0 : vector<1x3x3xf32> to vector<3x3xf32>
    %c0_2 = arith.constant 0 : index
    %c0_3 = arith.constant 0 : index
    %c0_4 = arith.constant 0 : index
    %2 = vector.load %arg2[%c0_2, %c0_3, %c0_4] : memref<1x3x3xf32, #tpu.memory_space<vmem>>, vector<1x3x3xf32>
    %3 = vector.shape_cast %2 : vector<1x3x3xf32> to vector<3x3xf32>
    %cst = arith.constant dense<0.000000e+00> : vector<3xf32>
    %4 = vector.multi_reduction <add>, %1, %cst [0] : vector<3x3xf32> to vector<3xf32>
    %5 = vector.shape_cast %4 : vector<3xf32> to vector<1x3xf32>
    %cst_5 = arith.constant 3.000000e+00 : f32
    %6 = vector.broadcast %cst_5 : f32 to vector<1x3xf32>
    %7 = arith.divf %5, %6 : vector<1x3xf32>
    %8 = vector.broadcast %7 : vector<1x3xf32> to vector<3x3xf32>
    %9 = arith.subf %1, %8 : vector<3x3xf32>
    %10 = arith.mulf %9, %9 : vector<3x3xf32>
    %cst_6 = arith.constant dense<0.000000e+00> : vector<3xf32>
    %11 = vector.multi_reduction <add>, %10, %cst_6 [0] : vector<3x3xf32> to vector<3xf32>
    %12 = vector.shape_cast %11 : vector<3xf32> to vector<1x3xf32>
    %cst_7 = arith.constant 3.000000e+00 : f32
    %13 = vector.broadcast %cst_7 : f32 to vector<1x3xf32>
    %14 = arith.divf %12, %13 : vector<1x3xf32>
    %cst_8 = arith.constant 9.99999974E-6 : f32
    %15 = vector.broadcast %cst_8 : f32 to vector<1x3xf32>
    %16 = arith.addf %14, %15 : vector<1x3xf32>
    %17 = math.rsqrt %16 : vector<1x3xf32>
    %18 = vector.broadcast %17 : vector<1x3xf32> to vector<3x3xf32>
    %19 = arith.mulf %9, %18 : vector<3x3xf32>
    %20 = tpu.iota {dimensions = array<i32: 1>} : vector<3x3xi32>
    %21 = tpu.iota {dimensions = array<i32: 0>} : vector<3x3xi32>
    %cst_9 = arith.constant 0.000000e+00 : f32
    %22 = vector.broadcast %cst_9 : f32 to vector<3x3xf32>
    %23 = vector.extract_strided_slice %19 {offsets = [0, 0], sizes = [3, 1], strides = [1, 1]} : vector<3x3xf32> to vector<3x1xf32>
    %c0_10 = arith.constant 0 : index
    %24 = memref.load %arg3[%c0_10] : memref<9xf32, #tpu.memory_space<smem>>
    %25 = vector.broadcast %24 : f32 to vector<3x1xf32>
    %26 = arith.mulf %23, %25 : vector<3x1xf32>
    %27 = vector.extract_strided_slice %19 {offsets = [0, 1], sizes = [3, 1], strides = [1, 1]} : vector<3x3xf32> to vector<3x1xf32>
    %c1 = arith.constant 1 : index
    %28 = memref.load %arg3[%c1] : memref<9xf32, #tpu.memory_space<smem>>
    %29 = vector.broadcast %28 : f32 to vector<3x1xf32>
    %30 = arith.mulf %27, %29 : vector<3x1xf32>
    %31 = arith.addf %26, %30 : vector<3x1xf32>
    %32 = vector.extract_strided_slice %19 {offsets = [0, 2], sizes = [3, 1], strides = [1, 1]} : vector<3x3xf32> to vector<3x1xf32>
    %c2 = arith.constant 2 : index
    %33 = memref.load %arg3[%c2] : memref<9xf32, #tpu.memory_space<smem>>
    %34 = vector.broadcast %33 : f32 to vector<3x1xf32>
    %35 = arith.mulf %32, %34 : vector<3x1xf32>
    %36 = arith.addf %31, %35 : vector<3x1xf32>
    %c0_i32 = arith.constant 0 : i32
    %37 = vector.broadcast %c0_i32 : i32 to vector<3x3xi32>
    %38 = arith.cmpi eq, %20, %37 : vector<3x3xi32>
    %cst_11 = arith.constant 0.000000e+00 : f32
    %39 = vector.shape_cast %36 : vector<3x1xf32> to vector<3x1xf32>
    %40 = vector.broadcast %39 : vector<3x1xf32> to vector<3x3xf32>
    %41 = vector.broadcast %cst_11 : f32 to vector<3x3xf32>
    %42 = arith.select %38, %40, %41 : vector<3x3xi1>, vector<3x3xf32>
    %43 = arith.addf %22, %42 : vector<3x3xf32>
    %44 = vector.extract_strided_slice %19 {offsets = [0, 0], sizes = [3, 1], strides = [1, 1]} : vector<3x3xf32> to vector<3x1xf32>
    %c3 = arith.constant 3 : index
    %45 = memref.load %arg3[%c3] : memref<9xf32, #tpu.memory_space<smem>>
    %46 = vector.broadcast %45 : f32 to vector<3x1xf32>
    %47 = arith.mulf %44, %46 : vector<3x1xf32>
    %48 = vector.extract_strided_slice %19 {offsets = [0, 1], sizes = [3, 1], strides = [1, 1]} : vector<3x3xf32> to vector<3x1xf32>
    %c4 = arith.constant 4 : index
    %49 = memref.load %arg3[%c4] : memref<9xf32, #tpu.memory_space<smem>>
    %50 = vector.broadcast %49 : f32 to vector<3x1xf32>
    %51 = arith.mulf %48, %50 : vector<3x1xf32>
    %52 = arith.addf %47, %51 : vector<3x1xf32>
    %53 = vector.extract_strided_slice %19 {offsets = [0, 2], sizes = [3, 1], strides = [1, 1]} : vector<3x3xf32> to vector<3x1xf32>
    %c5 = arith.constant 5 : index
    %54 = memref.load %arg3[%c5] : memref<9xf32, #tpu.memory_space<smem>>
    %55 = vector.broadcast %54 : f32 to vector<3x1xf32>
    %56 = arith.mulf %53, %55 : vector<3x1xf32>
    %57 = arith.addf %52, %56 : vector<3x1xf32>
    %c1_i32 = arith.constant 1 : i32
    %58 = vector.broadcast %c1_i32 : i32 to vector<3x3xi32>
    %59 = arith.cmpi eq, %20, %58 : vector<3x3xi32>
    %cst_12 = arith.constant 0.000000e+00 : f32
    %60 = vector.shape_cast %57 : vector<3x1xf32> to vector<3x1xf32>
    %61 = vector.broadcast %60 : vector<3x1xf32> to vector<3x3xf32>
    %62 = vector.broadcast %cst_12 : f32 to vector<3x3xf32>
    %63 = arith.select %59, %61, %62 : vector<3x3xi1>, vector<3x3xf32>
    %64 = arith.addf %43, %63 : vector<3x3xf32>
    %65 = vector.extract_strided_slice %19 {offsets = [0, 0], sizes = [3, 1], strides = [1, 1]} : vector<3x3xf32> to vector<3x1xf32>
    %c6 = arith.constant 6 : index
    %66 = memref.load %arg3[%c6] : memref<9xf32, #tpu.memory_space<smem>>
    %67 = vector.broadcast %66 : f32 to vector<3x1xf32>
    %68 = arith.mulf %65, %67 : vector<3x1xf32>
    %69 = vector.extract_strided_slice %19 {offsets = [0, 1], sizes = [3, 1], strides = [1, 1]} : vector<3x3xf32> to vector<3x1xf32>
    %c7 = arith.constant 7 : index
    %70 = memref.load %arg3[%c7] : memref<9xf32, #tpu.memory_space<smem>>
    %71 = vector.broadcast %70 : f32 to vector<3x1xf32>
    %72 = arith.mulf %69, %71 : vector<3x1xf32>
    %73 = arith.addf %68, %72 : vector<3x1xf32>
    %74 = vector.extract_strided_slice %19 {offsets = [0, 2], sizes = [3, 1], strides = [1, 1]} : vector<3x3xf32> to vector<3x1xf32>
    %c8 = arith.constant 8 : index
    %75 = memref.load %arg3[%c8] : memref<9xf32, #tpu.memory_space<smem>>
    %76 = vector.broadcast %75 : f32 to vector<3x1xf32>
    %77 = arith.mulf %74, %76 : vector<3x1xf32>
    %78 = arith.addf %73, %77 : vector<3x1xf32>
    %c2_i32 = arith.constant 2 : i32
    %79 = vector.broadcast %c2_i32 : i32 to vector<3x3xi32>
    %80 = arith.cmpi eq, %20, %79 : vector<3x3xi32>
    %cst_13 = arith.constant 0.000000e+00 : f32
    %81 = vector.shape_cast %78 : vector<3x1xf32> to vector<3x1xf32>
    %82 = vector.broadcast %81 : vector<3x1xf32> to vector<3x3xf32>
    %83 = vector.broadcast %cst_13 : f32 to vector<3x3xf32>
    %84 = arith.select %80, %82, %83 : vector<3x3xi1>, vector<3x3xf32>
    %85 = arith.addf %64, %84 : vector<3x3xf32>
    %86 = arith.addf %85, %19 : vector<3x3xf32>
    %cst_14 = arith.constant 0.000000e+00 : f32
    %87 = vector.broadcast %cst_14 : f32 to vector<3x3xf32>
    %c0_i32_15 = arith.constant 0 : i32
    %88 = vector.broadcast %c0_i32_15 : i32 to vector<3x3xi32>
    %89 = arith.cmpi eq, %21, %88 : vector<3x3xi32>
    %cst_16 = arith.constant 0.000000e+00 : f32
    %90 = vector.broadcast %cst_16 : f32 to vector<3x3xf32>
    %91 = arith.select %89, %86, %90 : vector<3x3xi1>, vector<3x3xf32>
    %cst_17 = arith.constant dense<0.000000e+00> : vector<3xf32>
    %92 = vector.multi_reduction <add>, %91, %cst_17 [0] : vector<3x3xf32> to vector<3xf32>
    %93 = vector.shape_cast %92 : vector<3xf32> to vector<1x3xf32>
    %94 = vector.extract_strided_slice %86 {offsets = [0, 0], sizes = [3, 1], strides = [1, 1]} : vector<3x3xf32> to vector<3x1xf32>
    %95 = vector.broadcast %94 : vector<3x1xf32> to vector<3x3xf32>
    %96 = vector.broadcast %93 : vector<1x3xf32> to vector<3x3xf32>
    %97 = arith.mulf %95, %96 : vector<3x3xf32>
    %98 = arith.addf %87, %97 : vector<3x3xf32>
    %c1_i32_18 = arith.constant 1 : i32
    %99 = vector.broadcast %c1_i32_18 : i32 to vector<3x3xi32>
    %100 = arith.cmpi eq, %21, %99 : vector<3x3xi32>
    %cst_19 = arith.constant 0.000000e+00 : f32
    %101 = vector.broadcast %cst_19 : f32 to vector<3x3xf32>
    %102 = arith.select %100, %86, %101 : vector<3x3xi1>, vector<3x3xf32>
    %cst_20 = arith.constant dense<0.000000e+00> : vector<3xf32>
    %103 = vector.multi_reduction <add>, %102, %cst_20 [0] : vector<3x3xf32> to vector<3xf32>
    %104 = vector.shape_cast %103 : vector<3xf32> to vector<1x3xf32>
    %105 = vector.extract_strided_slice %86 {offsets = [0, 1], sizes = [3, 1], strides = [1, 1]} : vector<3x3xf32> to vector<3x1xf32>
    %106 = vector.broadcast %105 : vector<3x1xf32> to vector<3x3xf32>
    %107 = vector.broadcast %104 : vector<1x3xf32> to vector<3x3xf32>
    %108 = arith.mulf %106, %107 : vector<3x3xf32>
    %109 = arith.addf %98, %108 : vector<3x3xf32>
    %c2_i32_21 = arith.constant 2 : i32
    %110 = vector.broadcast %c2_i32_21 : i32 to vector<3x3xi32>
    %111 = arith.cmpi eq, %21, %110 : vector<3x3xi32>
    %cst_22 = arith.constant 0.000000e+00 : f32
    %112 = vector.broadcast %cst_22 : f32 to vector<3x3xf32>
    %113 = arith.select %111, %86, %112 : vector<3x3xi1>, vector<3x3xf32>
    %cst_23 = arith.constant dense<0.000000e+00> : vector<3xf32>
    %114 = vector.multi_reduction <add>, %113, %cst_23 [0] : vector<3x3xf32> to vector<3xf32>
    %115 = vector.shape_cast %114 : vector<3xf32> to vector<1x3xf32>
    %116 = vector.extract_strided_slice %86 {offsets = [0, 2], sizes = [3, 1], strides = [1, 1]} : vector<3x3xf32> to vector<3x1xf32>
    %117 = vector.broadcast %116 : vector<3x1xf32> to vector<3x3xf32>
    %118 = vector.broadcast %115 : vector<1x3xf32> to vector<3x3xf32>
    %119 = arith.mulf %117, %118 : vector<3x3xf32>
    %120 = arith.addf %109, %119 : vector<3x3xf32>
    %c0_24 = arith.constant 0 : index
    %c0_25 = arith.constant 0 : index
    %c0_26 = arith.constant 0 : index
    %121 = vector.load %arg4[%c0_24, %c0_25, %c0_26] : memref<1x3x3xf32, #tpu.memory_space<vmem>>, vector<1x3x3xf32>
    %122 = vector.shape_cast %121 : vector<1x3x3xf32> to vector<3x3xf32>
    %123 = vector.shape_cast %85 : vector<3x3xf32> to vector<1x3x3xf32>
    tpu.vector_store %arg4[%c0_24, %c0_25, %c0_26], %123 {strides = array<i32>} : memref<1x3x3xf32, #tpu.memory_space<vmem>>, vector<1x3x3xf32>,
    %124 = arith.addf %120, %3 : vector<3x3xf32>
    %c0_27 = arith.constant 0 : index
    %c0_28 = arith.constant 0 : index
    %c0_29 = arith.constant 0 : index
    %125 = vector.load %arg5[%c0_27, %c0_28, %c0_29] : memref<1x3x3xf32, #tpu.memory_space<vmem>>, vector<1x3x3xf32>
    %126 = vector.shape_cast %125 : vector<1x3x3xf32> to vector<3x3xf32>
    %127 = vector.shape_cast %124 : vector<3x3xf32> to vector<1x3x3xf32>
    tpu.vector_store %arg5[%c0_27, %c0_28, %c0_29], %127 {strides = array<i32>} : memref<1x3x3xf32, #tpu.memory_space<vmem>>, vector<1x3x3xf32>,
    %128 = arith.addf %85, %1 : vector<3x3xf32>
    %c0_30 = arith.constant 0 : index
    %c0_31 = arith.constant 0 : index
    %c0_32 = arith.constant 0 : index
    %129 = vector.load %arg6[%c0_30, %c0_31, %c0_32] : memref<1x3x3xf32, #tpu.memory_space<vmem>>, vector<1x3x3xf32>
    %130 = vector.shape_cast %129 : vector<1x3x3xf32> to vector<3x3xf32>
    %131 = vector.shape_cast %128 : vector<3x3xf32> to vector<1x3x3xf32>
    tpu.vector_store %arg6[%c0_30, %c0_31, %c0_32], %131 {strides = array<i32>} : memref<1x3x3xf32, #tpu.memory_space<vmem>>, vector<1x3x3xf32>,
    return
  }
  func.func @transform_0(%arg0: i32) -> (i32, i32, i32) {
    %c0_i32 = arith.constant 0 : i32
    %c0_i32_0 = arith.constant 0 : i32
    %c0_i32_1 = arith.constant 0 : i32
    return %arg0, %c0_i32, %c0_i32_0 : i32, i32, i32
  }
  func.func @transform_1(%arg0: i32) -> (i32, i32, i32) {
    %c0_i32 = arith.constant 0 : i32
    %c0_i32_0 = arith.constant 0 : i32
    %c0_i32_1 = arith.constant 0 : i32
    return %arg0, %c0_i32, %c0_i32_0 : i32, i32, i32
  }
  func.func @transform_2(%arg0: i32) -> i32 {
    %c0_i32 = arith.constant 0 : i32
    %c0_i32_0 = arith.constant 0 : i32
    return %c0_i32 : i32
  }
  func.func @transform_3(%arg0: i32) -> (i32, i32, i32) {
    %c0_i32 = arith.constant 0 : i32
    %c0_i32_0 = arith.constant 0 : i32
    %c0_i32_1 = arith.constant 0 : i32
    return %arg0, %c0_i32, %c0_i32_0 : i32, i32, i32
  }
  func.func @transform_4(%arg0: i32) -> (i32, i32, i32) {
    %c0_i32 = arith.constant 0 : i32
    %c0_i32_0 = arith.constant 0 : i32
    %c0_i32_1 = arith.constant 0 : i32
    return %arg0, %c0_i32, %c0_i32_0 : i32, i32, i32
  }
  func.func @transform_5(%arg0: i32) -> (i32, i32, i32) {
    %c0_i32 = arith.constant 0 : i32
    %c0_i32_0 = arith.constant 0 : i32
    %c0_i32_1 = arith.constant 0 : i32
    return %arg0, %c0_i32, %c0_i32_0 : i32, i32, i32
  }
}

</mosaic_0001>

<bundles_post_ra>
// kernel: model_forward_batched.1
= control target key start
LH: loop header
LB: loop body
LE: loop exit
PB: predicated region body
PF: predicated region fallthrough
CT: control target
= control target key end

     0   :  { %11 = vsyncpa [#allocation3], 0  ;;  %s306_s0 = inlined_call_operand.vmem [shape: f32[1,3,3], index: 0, kind: input, shape index: {}]   ;;  %s307_s1 = inlined_call_operand.vmem [shape: f32[1,3,3], index: 1, kind: input, shape index: {}]   ;;  %s308_s2 = inlined_call_operand.vmem [shape: f32[9], index: 2, kind: input, shape index: {}]   ;;  %s309_s3 = inlined_call_operand.vmem [shape: f32[1,3,3], index: 3, kind: output, shape index: {0}]   ;;  %s310_s4 = inlined_call_operand.vmem [shape: f32[1,3,3], index: 4, kind: output, shape index: {1}]   ;;  %s311_s5 = inlined_call_operand.vmem [shape: f32[1,3,3], index: 5, kind: output, shape index: {2}]  }
   0x1   :  { %s22_s20 = sshll.u32 %s308_s2, 4  ;;  %s23_s20 = int_to_ptr.vmem [resolvable:$true] %s22_s20 }
   0x2   :  { %s225_s21 = scalar_lea.vmem %s23_s20, 16  ;;  %p230_p1 = scmp.lt.s32.totalorder %s23_s20, %s23_s20 }
   0x3   :  { %p226_p0 = scmp.ne.s32.totalorder %s23_s20, %s225_s21  ;;  %p231_p2 = scmp.lt.s32.totalorder %s225_s21, %s225_s21 }
   0x5   :  { %p232_p3 = por %p231_p2, %p230_p1 }
   0x7   :  { %p233_p4 = pnand %p232_p3, %p226_p0 }
   0x9   :  { %236 = shalt.err (!%p233_p4)
}
   0xa   :  { %s239_s22 = smov [#allocation2]  }
   0xb   :  { %25 = dma.vmem_to_smem %s23_s20, 16, %s239_s22, [#allocation3]  }
   0xc   :  { %237 = dma.done.wait [#allocation3], 16  }
   0xd   :  { %238 = vsyncadd [#allocation3], 4294967280 }
   0xe   :  { %29 = sfence }
   0xf   :  { %v281_v0 = vld [vmem:[%s306_s0] sm:$0x7]  ;;  %vm32_vm0 = vcmask 18432   ;;  %s205_s0 = sld [smem:[#allocation2 + $0x1]]  ;;  %s206_s2 = sld [smem:[#allocation2 + $0x2]]  ;;  %v240_v20 = vmov 0   ;;  %v55_v54 = vlaneseq }
  0x10   :  { %v33_v1 = vsel %vm32_vm0, %v281_v0, 0.0  ;;  %s208_s25 = sld [smem:[#allocation2 + $0x4]]  ;;  %s209_s26 = sld [smem:[#allocation2 + $0x5]]  ;;  %219 = vset.pattern.permute.xlu0 %v240_v20  ;;  %220 = vset.pattern.permute.xlu1 %v240_v20  ;;  %v243_v53 = vmov 1  }
  0x11   :  { %v34_v2 = vrot.slane %v33_v1, 4  ;;  %s211_s27 = sld [smem:[#allocation2 + $0x7]]  ;;  %s212_s28 = sld [smem:[#allocation2 + $0x8]]  ;;  %v56_v55 = vand.u32 127, %v55_v54  ;;  %v58_v59 = vshrl.u32 %v55_v54, 7 }
  0x12   :  { %s241_s29 = smov 127   ;;  %s242_s30 = smov 126  }
  0x13   :  { %v35_v3 = vadd.f32 %v34_v2, %v33_v1  ;;  %s59_s6 = sld [smem:[#allocation2]]  ;;  %s207_s7 = sld [smem:[#allocation2 + $0x3]]  ;;  %vm105_vm1 = vcmp.eq.s32.totalorder %v56_v55, 1  ;;  %vm78_vm2 = vcmp.eq.s32.totalorder %v56_v55, 0  ;;  %vm132_vm3 = vcmp.eq.s32.totalorder %v56_v55, 2 }
  0x14   :  { %s210_s8 = sld [smem:[#allocation2 + $0x6]]  ;;  %vm157_vm4 = vcmp.eq.s32.totalorder %v58_v59, 1  ;;  %vm141_vm5 = vcmp.eq.s32.totalorder %v58_v59, 0  ;;  %vm172_vm6 = vcmp.eq.s32.totalorder %v58_v59, 2 }
  0x15   :  { %v36_v4 = vrot.slane %v35_v3, 2  ;;  %v63_v22 = vstv %s205_s0  ;;  %v71_v23 = vstv %s206_s2 }
  0x16   :  { %v90_v25 = vstv %s208_s25  ;;  %v98_v26 = vstv %s209_s26 }
  0x17   :  { %v37_v5 = vadd.f32 %v36_v4, %v35_v3  ;;  %v117_v31 = vstv %s211_s27  ;;  %v125_v32 = vstv %s212_s28 }
  0x19   :  { %v38_v6 = vrot.slane %v37_v5, 1  ;;  %v60_v35 = vstv %s59_s6  ;;  %v87_v37 = vstv %s207_s7 }
  0x1a   :  { %v114_v42 = vstv %s210_s8 }
  0x1b   :  { %v39_v7 = vadd.f32 %v38_v6, %v37_v5 }
  0x1d   :  { %v41_v8 = vmul.f32 0.33333334, %v39_v7  ;;  %v244_v7 = vmov 2  }
  0x1f   :  { %v42_v9 = vsub.f32 %v281_v0, %v41_v8 }
  0x21   :  { %v43_v10 = vmul.f32 %v42_v9, %v42_v9 }
  0x23   :  { %v44_v11 = vsel %vm32_vm0, %v43_v10, 0.0 }
  0x24   :  { %v45_v12 = vrot.slane %v44_v11, 4 }
  0x26   :  { %v46_v13 = vadd.f32 %v45_v12, %v44_v11 }
  0x28   :  { %v47_v14 = vrot.slane %v46_v13, 2 }
  0x2a   :  { %v48_v15 = vadd.f32 %v47_v14, %v46_v13 }
  0x2c   :  { %v49_v16 = vrot.slane %v48_v15, 1 }
  0x2e   :  { %v50_v17 = vadd.f32 %v49_v16, %v48_v15 }
  0x30   :  { %v51_v18 = vmul.f32 0.33333334, %v50_v17 }
  0x32   :  { %v52_v19 = vadd.f32 1e-05, %v51_v18 }
  0x34   :  { %223 = vrsqrt.f32 %v52_v19 }
  0x3e   :  { %v224_v21 = vpop.eup %223 }
  0x3f   :  { %v54_v24 = vmul.f32 %v224_v21, %v42_v9 }
  0x41   :  { %v64_v27 = vmul.f32 %v63_v22, %v54_v24  ;;  %v72_v28 = vmul.f32 %v71_v23, %v54_v24  ;;  %v91_v29 = vmul.f32 %v90_v25, %v54_v24  ;;  %v99_v30 = vmul.f32 %v98_v26, %v54_v24 }
  0x42   :  { %v118_v33 = vmul.f32 %v117_v31, %v54_v24  ;;  %v126_v34 = vmul.f32 %v125_v32, %v54_v24  ;;  %v61_v36 = vmul.f32 %v60_v35, %v54_v24  ;;  %v88_v41 = vmul.f32 %v87_v37, %v54_v24  ;;  %v31_v35 = vld [vmem:[%s307_s1] sm:$0x7] }
  0x43   :  { %66 = vrot.lane.b32.xlu0 %v64_v27, %s241_s29  ;;  %74 = vrot.lane.b32.xlu1 %v72_v28, %s242_s30  ;;  %v115_v47 = vmul.f32 %v114_v42, %v54_v24 }
  0x47   :  { %93 = vrot.lane.b32.xlu0 %v91_v29, %s241_s29  ;;  %101 = vrot.lane.b32.xlu1 %v99_v30, %s242_s30 }
  0x4b   :  { %120 = vrot.lane.b32.xlu0 %v118_v33, %s241_s29  ;;  %128 = vrot.lane.b32.xlu1 %v126_v34, %s242_s30 }
  0xb5   :  { %v67_v38 = vpop.permute.xlu0 %66  ;;  %v75_v39 = vpop.permute.xlu1 %74 }
  0xb6   :  { %v69_v40 = vadd.f32 %v67_v38, %v61_v36 }
  0xb8   :  { %v77_v43 = vadd.f32 %v75_v39, %v69_v40 }
  0xb9   :  { %v94_v44 = vpop.permute.xlu0 %93  ;;  %v102_v45 = vpop.permute.xlu1 %101 }
  0xba   :  { %v96_v46 = vadd.f32 %v94_v44, %v88_v41  ;;  %81 = vperm.xlu0 %219, %v77_v43  }
  0xbc   :  { %v104_v48 = vadd.f32 %v102_v45, %v96_v46 }
  0xbd   :  { %v121_v49 = vpop.permute.xlu0 %120  ;;  %v129_v50 = vpop.permute.xlu1 %128 }
  0xbe   :  { %v123_v51 = vadd.f32 %v121_v49, %v115_v47  ;;  %108 = vperm.xlu1 %220, %v104_v48  }
  0xc0   :  { %v131_v52 = vadd.f32 %v129_v50, %v123_v51 }
  0xc2   :  { %135 = vperm.xlu1 %220, %v131_v52  }
  0xc6   :  { %221 = vset.pattern.permute.xlu1 %v243_v53 }
 0x139   :  { %v82_v56 = vpop.permute.xlu0 %81 }
 0x13a   :  { %v84_v60 = vsel %vm78_vm2, %v82_v56, 0.0 }
 0x13d   :  { %v109_v57 = vpop.permute.xlu1 %108 }
 0x13e   :  { %v111_v58 = vsel %vm105_vm1, %v109_v57, 0.0 }
 0x13f   :  { %v112_v61 = vadd.f32 %v111_v58, %v84_v60 }
 0x141   :  { %v136_v62 = vpop.permute.xlu1 %135 }
 0x142   :  { %v138_v63 = vsel %vm132_vm3, %v136_v62, 0.0 }
 0x143   :  { %v139_v1 = vadd.f32 %v138_v63, %v112_v61 }
 0x145   :  { %v140_v2 = vadd.f32 %v139_v1, %v54_v24  ;;  %187 = vst.msk [vmem:[%s309_s3] sm:$0x7] %vm32_vm0, %v139_v1  ;;  %v190_v3 = vadd.f32 %v139_v1, %v281_v0 }
 0x147   :  { %191 = vst.msk [vmem:[%s311_s5] sm:$0x7] %vm32_vm0, %v190_v3  ;;  %167 = vperm.xlu1 %221, %v140_v2   ;;  %152 = vperm.xlu0 %219, %v140_v2   ;;  %v158_v4 = vsel %vm157_vm4, %v140_v2, 0.0  ;;  %v142_v5 = vsel %vm141_vm5, %v140_v2, 0.0  ;;  %v173_v6 = vsel %vm172_vm6, %v140_v2, 0.0 }
 0x148   :  { %v159_v8 = vsel %vm32_vm0, %v158_v4, 0.0  ;;  %v143_v9 = vsel %vm32_vm0, %v142_v5, 0.0  ;;  %v174_v0 = vsel %vm32_vm0, %v173_v6, 0.0 }
 0x149   :  { %v160_v10 = vrot.slane %v159_v8, 4  ;;  %v144_v11 = vrot.slane %v143_v9, 4  ;;  %v175_v14 = vrot.slane %v174_v0, 4 }
 0x14b   :  { %222 = vset.pattern.permute.xlu0 %v244_v7  ;;  %v161_v12 = vadd.f32 %v160_v10, %v159_v8  ;;  %v145_v13 = vadd.f32 %v144_v11, %v143_v9  ;;  %v176_v17 = vadd.f32 %v175_v14, %v174_v0 }
 0x14c   :  { %182 = vperm.xlu0 %222, %v140_v2  }
 0x14d   :  { %v162_v15 = vrot.slane %v161_v12, 2  ;;  %v146_v16 = vrot.slane %v145_v13, 2  ;;  %v177_v20 = vrot.slane %v176_v17, 2 }
 0x14f   :  { %v163_v18 = vadd.f32 %v162_v15, %v161_v12  ;;  %v147_v19 = vadd.f32 %v146_v16, %v145_v13  ;;  %v178_v23 = vadd.f32 %v177_v20, %v176_v17 }
 0x151   :  { %v164_v21 = vrot.slane %v163_v18, 1  ;;  %v148_v22 = vrot.slane %v147_v19, 1  ;;  %v179_v28 = vrot.slane %v178_v23, 1 }
 0x153   :  { %v165_v24 = vadd.f32 %v164_v21, %v163_v18  ;;  %v149_v25 = vadd.f32 %v148_v22, %v147_v19  ;;  %v180_v32 = vadd.f32 %v179_v28, %v178_v23 }
 0x1c6   :  { %v168_v26 = vpop.permute.xlu1 %167  ;;  %v153_v27 = vpop.permute.xlu0 %152 }
 0x1c7   :  { %v170_v29 = vmul.f32 %v168_v26, %v165_v24  ;;  %v155_v30 = vmul.f32 %v153_v27, %v149_v25 }
 0x1c9   :  { %v171_v31 = vadd.f32 %v170_v29, %v155_v30 }
 0x1cb   :  { %v183_v33 = vpop.permute.xlu0 %182 }
 0x1cc   :  { %v185_v34 = vmul.f32 %v183_v33, %v180_v32 }
 0x1ce   :  { %v186_v36 = vadd.f32 %v185_v34, %v171_v31 }
 0x1d0   :  { %v188_v37 = vadd.f32 %v186_v36, %v31_v35 }
 0x1d2   :  { %189 = vst.msk [vmem:[%s310_s4] sm:$0x7] %vm32_vm0, %v188_v37 }
 0x1d3   :  { %204 = vsyncpa [#allocation3], 1 }

</bundles_post_ra>
